<compile_context>
chip_gen: v6e
topology: v6e:2x2x1
jax: 0.10.0
libtpu: 0.0.40
codegen_flags: <defaults>
</compile_context>

<pallas_src>
import functools

import numpy as np
import jax
import jax.numpy as jnp
from jax.experimental import pallas as pl
from jax.experimental.pallas import tpu as pltpu


# ---------------------------------------------------------------------------
# Fused kernel: one grid step == one image; 1 + 2*K small MXU matmuls total.
# ---------------------------------------------------------------------------
def _fused_kernel(x_ref, wpw_ref, rh_ref, g_ref, o_ref, *, K, Ho, Wo, C_out):
    # x_ref   : (1, H, C_in*W)            f32 VMEM   x[b] as (H, C_in*W) slab
    # wpw_ref : (C_in*W, C_mid*W)         f32 VMEM   kron(pw^T, I_W)
    # rh_ref  : (K, Ho, H)                f32 VMEM   kh-shifted padded height-interp mats
    # g_ref   : (K, C_mid*W, C_out*Wo)    f32 VMEM   width-interp (+ zero pad) folded into conv taps
    # o_ref   : (1, Ho, C_out*Wo)         f32 VMEM   lane-dense output slab

    # 1) pointwise conv + ReLU6 (MXU): result already in (H, C_mid*W) layout.
    y = jnp.clip(
        jnp.dot(x_ref[0], wpw_ref[...], preferred_element_type=jnp.float32),
        0.0, 6.0)                                            # (H, C_mid*W)

    # 2) + 3) height interp (batched over C_mid) and width-interp+conv folded
    #         into G; accumulate the lane-dense output slab in vregs.
    acc = jnp.zeros((Ho, C_out * Wo), jnp.float32)
    for kh in range(K):                                      # K is small & static
        t_kh = jnp.dot(rh_ref[kh], y,
                       preferred_element_type=jnp.float32)   # (Ho, C_mid*W)
        acc = acc + jnp.dot(t_kh, g_ref[kh],
                            preferred_element_type=jnp.float32)  # (Ho, C_out*Wo)

    o_ref[0] = jnp.clip(acc, 0.0, 6.0)


# ---------------------------------------------------------------------------
# Host-side helpers (numpy constants, computed once per shape)
# ---------------------------------------------------------------------------
def _interp_matrix(n_in, n_out):
    """Row-stochastic 1-D linear interpolation matrix, align_corners=True."""
    if n_out == 1:
        src = np.zeros((1,), np.float64)
    else:
        src = np.arange(n_out, dtype=np.float64) * (n_in - 1) / (n_out - 1)
    i0 = np.clip(np.floor(src), 0, n_in - 1).astype(np.int64)
    i1 = np.minimum(i0 + 1, n_in - 1)
    frac = (src - i0).astype(np.float32)
    R = np.zeros((n_out, n_in), np.float32)
    R[np.arange(n_out), i0] += (1.0 - frac)
    R[np.arange(n_out), i1] += frac
    return R


# ---------------------------------------------------------------------------
# Wrapper
# ---------------------------------------------------------------------------
def phinet_gan_block(x, pw_w, conv_w, up_factor):
    """x: (B, C_in, H, W) f32 (the PhinetGanBlock applied per sample);
       pw_w: (C_mid, C_in) [torch 1x1 weight squeezed];
       conv_w: (C_out, C_mid, K, K) [torch OIHW].
       Returns (B, C_out, H*up, W*up)."""
    B, C_in, H, W = x.shape
    C_mid = pw_w.shape[0]
    C_out, _, K, _ = conv_w.shape
    Ho, Wo = H * up_factor, W * up_factor
    p = K // 2                      # odd K only (torch 'same', as in the module)
    CW_in, CW_mid, CW_out = C_in * W, C_mid * W, C_out * Wo

    # ---- numpy constants: zero-padded interp matrices (zero rows == 'same' pad)
    Rh_pad = np.zeros((Ho + 2 * p, H), np.float32)
    Rh_pad[p:p + Ho, :] = _interp_matrix(H, Ho)
    Rw_pad = np.zeros((Wo + 2 * p, W), np.float32)
    Rw_pad[p:p + Wo, :] = _interp_matrix(W, Wo)
    # kh-shifted height matrices: Rh_sh[kh, ho, h] = Rh_pad[ho+kh, h]
    rh_sh = np.stack([Rh_pad[kh:kh + Ho, :] for kh in range(K)])      # (K, Ho, H)
    # kw-shifted width matrices:  Rw_sh[kw, wo, w] = Rw_pad[wo+kw, w]
    rw_sh = np.stack([Rw_pad[kw:kw + Wo, :] for kw in range(K)])      # (K, Wo, W)

    # ---- pointwise weight as block-diagonal so the matmul emits (H, C_mid*W)
    pw_f = jnp.asarray(pw_w, jnp.float32)
    wpw = jnp.kron(pw_f.T, jnp.eye(W, dtype=jnp.float32))             # (C_in*W, C_mid*W)

    # ---- KxK conv weights with width interp + zero pad folded in:
    #      G[kh, m*W+w, o*Wo+wo] = sum_kw conv_w[o,m,kh,kw] * Rw_pad[wo+kw, w]
    G = jnp.einsum('omab,bvw->amwov',
                   jnp.asarray(conv_w, jnp.float32), jnp.asarray(rw_sh))
    G = G.reshape(K, CW_mid, CW_out)                                   # (K, C_mid*W, C_out*Wo)

    # ---- input slab: x[b,c,h,w] -> (B, H, C_in*W)  (lane-dense, 128 lanes)
    x_slab = jnp.transpose(x.astype(jnp.float32), (0, 2, 1, 3)).reshape(B, H, CW_in)

    kernel = functools.partial(_fused_kernel, K=K, Ho=Ho, Wo=Wo, C_out=C_out)

    flops = B * (2 * H * CW_in * CW_mid
                 + K * 2 * Ho * H * CW_mid
                 + K * 2 * Ho * CW_mid * CW_out)
    bytes_accessed = 4 * (x_slab.size + wpw.size + rh_sh.size + G.size + B * Ho * CW_out)

    out_slab = pl.pallas_call(
        kernel,
        out_shape=jax.ShapeDtypeStruct((B, Ho, CW_out), jnp.float32),
        grid=(B,),
        in_specs=[
            pl.BlockSpec((1, H, CW_in), lambda b: (b, 0, 0)),          # per-image slab
            pl.BlockSpec((CW_in, CW_mid), lambda b: (0, 0)),           # shared weights
            pl.BlockSpec((K, Ho, H), lambda b: (0, 0, 0)),
            pl.BlockSpec((K, CW_mid, CW_out), lambda b: (0, 0, 0)),
        ],
        out_specs=pl.BlockSpec((1, Ho, CW_out), lambda b: (b, 0, 0)),
        compiler_params=pltpu.CompilerParams(
            dimension_semantics=("parallel",)),                        # shard batch across TCs (v7x)
        cost_estimate=pl.CostEstimate(flops=flops, transcendentals=0,
                                      bytes_accessed=bytes_accessed),
    )(x_slab, wpw, jnp.asarray(rh_sh), G)

    # lane-dense slab (B, Ho, C_out*Wo) -> PyTorch layout (B, C_out, Ho, Wo)
    return out_slab.reshape(B, Ho, C_out, Wo).transpose(0, 2, 1, 3)


# ---------------------------------------------------------------------------
# Pure-JAX reference (PyTorch module semantics) for correctness check
# ---------------------------------------------------------------------------
def _ref_bilinear(x, Ho, Wo):
    C, H, W = x.shape
    sy = jnp.arange(Ho, dtype=jnp.float32) * (H - 1) / (Ho - 1)
    sx = jnp.arange(Wo, dtype=jnp.float32) * (W - 1) / (Wo - 1)
    y0 = jnp.floor(sy).astype(jnp.int32); y1 = jnp.minimum(y0 + 1, H - 1); fy = sy - y0
    x0 = jnp.floor(sx).astype(jnp.int32); x1 = jnp.minimum(x0 + 1, W - 1); fx = sx - x0
    r0 = x[:, y0, :]
    r1 = x[:, y1, :]
    top = r0[:, :, x0] * (1 - fx)[None, None, :] + r0[:, :, x1] * fx[None, None, :]
    bot = r1[:, :, x0] * (1 - fx)[None, None, :] + r1[:, :, x1] * fx[None, None, :]
    return top * (1 - fy)[None, :, None] + bot * fy[None, :, None]


def reference(x, pw_w, conv_w, up_factor):
    C_in, H, W = x.shape
    y = jnp.clip(jnp.einsum('mc,chw->mhw', pw_w, x), 0.0, 6.0)
    z = _ref_bilinear(y, H * up_factor, W * up_factor)
    out = jax.lax.conv_general_dilated(
        z[None], conv_w, window_strides=(1, 1), padding='SAME',
        dimension_numbers=('NCHW', 'OIHW', 'NCHW'))[0]
    return jnp.clip(out, 0.0, 6.0)


# ---------------------------------------------------------------------------
if __name__ == "__main__":
    # PhinetGanBlock(in_shape=(8, 16, 16), expansion=2, filters=4, k_size=3, up_factor=2)
    # applied independently to a small batch (batch -> "parallel" grid axis).
    B, C_in, H, W = 2, 8, 16, 16
    expansion = 2
    filters = 4
    k_size = 3
    up_factor = 2
    C_mid = C_in // expansion

    key = jax.random.PRNGKey(0)
    kx, kw1, kw2 = jax.random.split(key, 3)
    x = jax.random.normal(kx, (B, C_in, H, W), dtype=jnp.float32)
    # PointwiseConv2D weight: torch (C_mid, C_in, 1, 1) -> stored (C_mid, C_in)
    pw_w = jax.random.normal(kw1, (C_mid, C_in), dtype=jnp.float32) * 0.2
    # Conv2D KxK weight: torch OIHW (C_out, C_mid, K, K)
    conv_w = jax.random.normal(kw2, (filters, C_mid, k_size, k_size),
                               dtype=jnp.float32) * 0.2

    out = jax.block_until_ready(phinet_gan_block(x, pw_w, conv_w, up_factor))
    ref = jax.block_until_ready(
        jnp.stack([reference(x[b], pw_w, conv_w, up_factor) for b in range(B)]))

    assert out.shape == (B, filters, H * up_factor, W * up_factor), out.shape
    assert jnp.allclose(out, ref, atol=5e-4, rtol=5e-4), \
        float(jnp.max(jnp.abs(out - ref)))

    print("KERNEL_OK")
</pallas_src>

<mosaic_0001>
module attributes {stable_mosaic.version = 11 : i64} {
  func.func @_fused_kernel(%arg0: i32, %arg1: memref<1x16x128xf32, #tpu.memory_space<vmem>>, %arg2: memref<128x64xf32, #tpu.memory_space<vmem>>, %arg3: memref<3x32x16xf32, #tpu.memory_space<vmem>>, %arg4: memref<3x64x128xf32, #tpu.memory_space<vmem>>, %arg5: memref<1x32x128xf32, #tpu.memory_space<vmem>>) attributes {dimension_semantics = [#tpu.dimension_semantics<parallel>], iteration_bounds = array<i64: 2>, scalar_prefetch = 0 : i64, scratch_operands = 0 : i64, tpu.core_type = #tpu.core_type<tc>, window_params = [{transform_indices = @transform_0, window_bounds = array<i64: 1, 16, 128>}, {pipeline_mode = #tpu.pipeline_mode<synchronous>, transform_indices = @transform_1, window_bounds = array<i64: 128, 64>}, {pipeline_mode = #tpu.pipeline_mode<synchronous>, transform_indices = @transform_2, window_bounds = array<i64: 3, 32, 16>}, {pipeline_mode = #tpu.pipeline_mode<synchronous>, transform_indices = @transform_3, window_bounds = array<i64: 3, 64, 128>}, {transform_indices = @transform_4, window_bounds = array<i64: 1, 32, 128>}]} {
    %c0 = arith.constant 0 : index
    %c0_0 = arith.constant 0 : index
    %c0_1 = arith.constant 0 : index
    %0 = vector.load %arg1[%c0, %c0_0, %c0_1] : memref<1x16x128xf32, #tpu.memory_space<vmem>>, vector<1x16x128xf32>
    %1 = vector.shape_cast %0 : vector<1x16x128xf32> to vector<16x128xf32>
    %c0_2 = arith.constant 0 : index
    %c0_3 = arith.constant 0 : index
    %2 = vector.load %arg2[%c0_2, %c0_3] : memref<128x64xf32, #tpu.memory_space<vmem>>, vector<128x64xf32>
    %cst = arith.constant dense<0.000000e+00> : vector<16x64xf32>
    %3 = tpu.matmul %1, %2, %cst {dimension_numbers = #tpu.dot_dimension_numbers<[1], [0], [0], [1], [0, 0, 1, 1], [], []>} : vector<16x128xf32>, vector<128x64xf32>, vector<16x64xf32> -> vector<16x64xf32>
    %cst_4 = arith.constant 0.000000e+00 : f32
    %cst_5 = arith.constant 6.000000e+00 : f32
    %4 = vector.broadcast %cst_4 : f32 to vector<16x64xf32>
    %5 = arith.maximumf %4, %3 : vector<16x64xf32>
    %6 = vector.broadcast %cst_5 : f32 to vector<16x64xf32>
    %7 = arith.minimumf %6, %5 : vector<16x64xf32>
    %cst_6 = arith.constant 0.000000e+00 : f32
    %8 = vector.broadcast %cst_6 : f32 to vector<32x128xf32>
    %c0_7 = arith.constant 0 : index
    %c0_8 = arith.constant 0 : index
    %c0_9 = arith.constant 0 : index
    %9 = vector.load %arg3[%c0_7, %c0_8, %c0_9] : memref<3x32x16xf32, #tpu.memory_space<vmem>>, vector<1x32x16xf32>
    %10 = vector.shape_cast %9 : vector<1x32x16xf32> to vector<32x16xf32>
    %cst_10 = arith.constant dense<0.000000e+00> : vector<32x64xf32>
    %11 = tpu.matmul %10, %7, %cst_10 {dimension_numbers = #tpu.dot_dimension_numbers<[1], [0], [0], [1], [0, 0, 1, 1], [], []>} : vector<32x16xf32>, vector<16x64xf32>, vector<32x64xf32> -> vector<32x64xf32>
    %c0_11 = arith.constant 0 : index
    %c0_12 = arith.constant 0 : index
    %c0_13 = arith.constant 0 : index
    %12 = vector.load %arg4[%c0_11, %c0_12, %c0_13] : memref<3x64x128xf32, #tpu.memory_space<vmem>>, vector<1x64x128xf32>
    %13 = vector.shape_cast %12 : vector<1x64x128xf32> to vector<64x128xf32>
    %cst_14 = arith.constant dense<0.000000e+00> : vector<32x128xf32>
    %14 = tpu.matmul %11, %13, %cst_14 {dimension_numbers = #tpu.dot_dimension_numbers<[1], [0], [0], [1], [0, 0, 1, 1], [], []>} : vector<32x64xf32>, vector<64x128xf32>, vector<32x128xf32> -> vector<32x128xf32>
    %15 = arith.addf %8, %14 : vector<32x128xf32>
    %c1 = arith.constant 1 : index
    %c0_15 = arith.constant 0 : index
    %c0_16 = arith.constant 0 : index
    %16 = vector.load %arg3[%c1, %c0_15, %c0_16] : memref<3x32x16xf32, #tpu.memory_space<vmem>>, vector<1x32x16xf32>
    %17 = vector.shape_cast %16 : vector<1x32x16xf32> to vector<32x16xf32>
    %cst_17 = arith.constant dense<0.000000e+00> : vector<32x64xf32>
    %18 = tpu.matmul %17, %7, %cst_17 {dimension_numbers = #tpu.dot_dimension_numbers<[1], [0], [0], [1], [0, 0, 1, 1], [], []>} : vector<32x16xf32>, vector<16x64xf32>, vector<32x64xf32> -> vector<32x64xf32>
    %c1_18 = arith.constant 1 : index
    %c0_19 = arith.constant 0 : index
    %c0_20 = arith.constant 0 : index
    %19 = vector.load %arg4[%c1_18, %c0_19, %c0_20] : memref<3x64x128xf32, #tpu.memory_space<vmem>>, vector<1x64x128xf32>
    %20 = vector.shape_cast %19 : vector<1x64x128xf32> to vector<64x128xf32>
    %cst_21 = arith.constant dense<0.000000e+00> : vector<32x128xf32>
    %21 = tpu.matmul %18, %20, %cst_21 {dimension_numbers = #tpu.dot_dimension_numbers<[1], [0], [0], [1], [0, 0, 1, 1], [], []>} : vector<32x64xf32>, vector<64x128xf32>, vector<32x128xf32> -> vector<32x128xf32>
    %22 = arith.addf %15, %21 : vector<32x128xf32>
    %c2 = arith.constant 2 : index
    %c0_22 = arith.constant 0 : index
    %c0_23 = arith.constant 0 : index
    %23 = vector.load %arg3[%c2, %c0_22, %c0_23] : memref<3x32x16xf32, #tpu.memory_space<vmem>>, vector<1x32x16xf32>
    %24 = vector.shape_cast %23 : vector<1x32x16xf32> to vector<32x16xf32>
    %cst_24 = arith.constant dense<0.000000e+00> : vector<32x64xf32>
    %25 = tpu.matmul %24, %7, %cst_24 {dimension_numbers = #tpu.dot_dimension_numbers<[1], [0], [0], [1], [0, 0, 1, 1], [], []>} : vector<32x16xf32>, vector<16x64xf32>, vector<32x64xf32> -> vector<32x64xf32>
    %c2_25 = arith.constant 2 : index
    %c0_26 = arith.constant 0 : index
    %c0_27 = arith.constant 0 : index
    %26 = vector.load %arg4[%c2_25, %c0_26, %c0_27] : memref<3x64x128xf32, #tpu.memory_space<vmem>>, vector<1x64x128xf32>
    %27 = vector.shape_cast %26 : vector<1x64x128xf32> to vector<64x128xf32>
    %cst_28 = arith.constant dense<0.000000e+00> : vector<32x128xf32>
    %28 = tpu.matmul %25, %27, %cst_28 {dimension_numbers = #tpu.dot_dimension_numbers<[1], [0], [0], [1], [0, 0, 1, 1], [], []>} : vector<32x64xf32>, vector<64x128xf32>, vector<32x128xf32> -> vector<32x128xf32>
    %29 = arith.addf %22, %28 : vector<32x128xf32>
    %cst_29 = arith.constant 0.000000e+00 : f32
    %cst_30 = arith.constant 6.000000e+00 : f32
    %30 = vector.broadcast %cst_29 : f32 to vector<32x128xf32>
    %31 = arith.maximumf %30, %29 : vector<32x128xf32>
    %32 = vector.broadcast %cst_30 : f32 to vector<32x128xf32>
    %33 = arith.minimumf %32, %31 : vector<32x128xf32>
    %c0_31 = arith.constant 0 : index
    %c0_32 = arith.constant 0 : index
    %c0_33 = arith.constant 0 : index
    %34 = vector.load %arg5[%c0_31, %c0_32, %c0_33] : memref<1x32x128xf32, #tpu.memory_space<vmem>>, vector<1x32x128xf32>
    %35 = vector.shape_cast %34 : vector<1x32x128xf32> to vector<32x128xf32>
    %36 = vector.shape_cast %33 : vector<32x128xf32> to vector<1x32x128xf32>
    tpu.vector_store %arg5[%c0_31, %c0_32, %c0_33], %36 {strides = array<i32>} : memref<1x32x128xf32, #tpu.memory_space<vmem>>, vector<1x32x128xf32>,
    return
  }
  func.func @transform_0(%arg0: i32) -> (i32, i32, i32) {
    %c0_i32 = arith.constant 0 : i32
    %c0_i32_0 = arith.constant 0 : i32
    %c0_i32_1 = arith.constant 0 : i32
    return %arg0, %c0_i32, %c0_i32_0 : i32, i32, i32
  }
  func.func @transform_1(%arg0: i32) -> (i32, i32) {
    %c0_i32 = arith.constant 0 : i32
    %c0_i32_0 = arith.constant 0 : i32
    %c0_i32_1 = arith.constant 0 : i32
    return %c0_i32, %c0_i32_0 : i32, i32
  }
  func.func @transform_2(%arg0: i32) -> (i32, i32, i32) {
    %c0_i32 = arith.constant 0 : i32
    %c0_i32_0 = arith.constant 0 : i32
    %c0_i32_1 = arith.constant 0 : i32
    %c0_i32_2 = arith.constant 0 : i32
    return %c0_i32, %c0_i32_0, %c0_i32_1 : i32, i32, i32
  }
  func.func @transform_3(%arg0: i32) -> (i32, i32, i32) {
    %c0_i32 = arith.constant 0 : i32
    %c0_i32_0 = arith.constant 0 : i32
    %c0_i32_1 = arith.constant 0 : i32
    %c0_i32_2 = arith.constant 0 : i32
    return %c0_i32, %c0_i32_0, %c0_i32_1 : i32, i32, i32
  }
  func.func @transform_4(%arg0: i32) -> (i32, i32, i32) {
    %c0_i32 = arith.constant 0 : i32
    %c0_i32_0 = arith.constant 0 : i32
    %c0_i32_1 = arith.constant 0 : i32
    return %arg0, %c0_i32, %c0_i32_0 : i32, i32, i32
  }
}

</mosaic_0001>

<bundles_post_ra>
// kernel: tpu_custom_call.1
= control target key start
LH: loop header
LB: loop body
LE: loop exit
PB: predicated region body
PF: predicated region fallthrough
CT: control target
= control target key end

     0   :  { %9 = vsyncpa [#allocation3], 0  ;;  %s1695_s0 = inlined_call_operand.vmem [shape: f32[2,16,128], index: 0, kind: input, shape index: {}]   ;;  %s1696_s1 = inlined_call_operand.vmem [shape: f32[128,64], index: 1, kind: input, shape index: {}]   ;;  %s1697_s2 = inlined_call_operand.vmem [shape: f32[3,32,16], index: 2, kind: input, shape index: {}]   ;;  %s1698_s3 = inlined_call_operand.vmem [shape: f32[3,64,128], index: 3, kind: input, shape index: {}]   ;;  %s1699_s4 = inlined_call_operand.hbm [shape: f32[2,32,128], index: 4, kind: output, shape index: {}]  }
   0x1   :  { %11 = vsyncpa [#allocation3 + $0x1], 0  ;;  %s1405_s15 = smov 0   ;;  %s1407_s16 = smov 0  }
   0x2   :  { %s1409_s17 = smov 0   ;;  %s1411_s18 = smov 0  }
   0x3 LB: > { %s1426_s19 = sadd.s32 4294967295, %s1375_s18   ;;  %s1009_s20 = sadd.s32 4294967294, %s1375_s18   ;;  %s1375_s18 = sphi %s1411_s18, %s1705_s18   ;;  %s1371_s17 = sphi %s1409_s17, %s1704_s17   ;;  %s1367_s16 = sphi %s1407_s16, %s1703_s16   ;;  %s1363_s15 = sphi %s1405_s15, %s1702_s15  }
   0x4   : > { %s1430_s21 = sadd.s32 1, %s1375_s18   ;;  %s113_s22 = sadd.s32 1, %s1371_s17 }
   0x5   : > { %s110_s23 = ssub.s32 %s1375_s18, %s1430_s21  ;;  %p123_p0 = scmp.ne.s32.totalorder %s1371_s17, %s1367_s16 }
   0x6   : > { %p111_p1 = scmp.eq.s32.totalorder %s110_s23, 0  ;;  %p124_p2 = scmp.eq.s32.totalorder %s1426_s19, 1 }
   0x7   : > { %p129_p3 = scmp.ne.s32.totalorder %s1367_s16, %s1363_s15  ;;  %p130_p4 = scmp.eq.s32.totalorder %s1009_s20, 1 }
   0x8   : > { %s1441_s24 = scalar_select %p111_p1, %s1371_s17, %s113_s22  }
   0x9   : > { %p1443_p5 = por %p124_p2, %p123_p0  ;;  %p1447_p6 = por %p130_p4, %p129_p3 }
   0xa   : > { %p1012_p7 = scmp.ge.s32.totalorder %s1375_s18, 1  ;;  %p165_p8 = scmp.lt.s32.totalorder %s1375_s18, 3 }
   0xc   : > { %p166_p9 = pnand %p1012_p7, %p165_p8 }
   0xd   : > { %p191_p10 = scmp.lt.s32.totalorder (!%p166_p9), %s1426_s19, 1  ;;  %s1070_s12 = sshll.u32 (!%p166_p9), %s1426_s19, 9 }
   0xe   : > { %169 = sbr.rel (%p166_p9) target bundleno = 694 (0x2b6), region = 36  ;;  %s1651_s22 = scalar_lea.hbm (!%p166_p9), %s1699_s4, %s1070_s12 }
   0xf   : > { %s1377_s27 = smov (!%p166_p9), [#allocation2]  }
  0x10   : > { %s1319_s28 = sshll.u32 (!%p166_p9), %s1377_s27, 4  ;;  %s1320_s28 = int_to_ptr.vmem [resolvable:$false] %s1319_s28 }
  0x11   : > { %s1321_s29 = scalar_lea.vmem (!%p166_p9), %s1320_s28, 1024 }
  0x13   : > { %v213_v0 = vld [vmem:[%s1696_s1 + $0x78] sm:$0xff]  ;;  %v212_v1 = vld [vmem:[%s1696_s1 + $0x70] sm:$0xff]  ;;  %v211_v2 = vld [vmem:[%s1696_s1 + $0x68] sm:$0xff]  ;;  %s192_s7 = scalar_select %p191_p10, %s1426_s19, 1  ;;  %vm297_vm0 = vcmask 130048   ;;  %vm514_vm1 = vcmask 523264  }
  0x14   : > { %1143 = vmatprep.subr.mxu0 %v213_v0  ;;  %v210_v3 = vld [vmem:[%s1696_s1 + $0x60] sm:$0xff]  ;;  %v209_v4 = vld [vmem:[%s1696_s1 + $0x58] sm:$0xff]  ;;  %v208_v6 = vld [vmem:[%s1696_s1 + $0x50] sm:$0xff] }
  0x15   : > { %1144 = vmatpush3.msra.mxu0 %v213_v0  ;;  %s1069_s10 = sshll.u32 %s192_s7, 4  ;;  %v207_v7 = vld [vmem:[%s1696_s1 + $0x48] sm:$0xff]  ;;  %v206_v8 = vld [vmem:[%s1696_s1 + $0x40] sm:$0xff]  ;;  %v205_v9 = vld [vmem:[%s1696_s1 + $0x38] sm:$0xff] }
  0x16   : > { %1145 = vmatprep.subr.mxu0 %v212_v1  ;;  %s1470_s13 = scalar_lea.vmem %s1695_s0, %s1069_s10  ;;  %v204_v10 = vld [vmem:[%s1696_s1 + $0x30] sm:$0xff]  ;;  %v203_v11 = vld [vmem:[%s1696_s1 + $0x28] sm:$0xff]  ;;  %v202_v12 = vld [vmem:[%s1696_s1 + $0x20] sm:$0xff] }
  0x17   : > { %1146 = vmatpush3.msra.mxu0 %v212_v1  ;;  %v196_v5 = vld [vmem:[%s1470_s13] sm:$0xff]  ;;  %v201_v13 = vld [vmem:[%s1696_s1 + $0x18] sm:$0xff]  ;;  %v200_v14 = vld [vmem:[%s1696_s1 + $0x10] sm:$0xff] }
  0x18   : > { %1147 = vmatprep.subr.mxu0 %v211_v2  ;;  %1175 = vmatprep.mubr.f32.mxu0 %v196_v5  ;;  %v199_v15 = vld [vmem:[%s1696_s1 + $0x8] sm:$0xff]  ;;  %v198_v16 = vld [vmem:[%s1696_s1] sm:$0xff]  ;;  %v295_v27 = vld [vmem:[%s1697_s2 + $0x10] sm:$0xff] }
  0x19   : > { %1148 = vmatpush3.msra.mxu0 %v211_v2  ;;  %v197_v17 = vld [vmem:[%s1470_s13 + $0x8] sm:$0xff]  ;;  %v293_v18 = vld [vmem:[%s1697_s2] sm:$0xff]  ;;  %v1046_v29 = vld [vmem:[%s1697_s2 + $0x50] sm:$0xff]  ;;  %s188_s13 = sand.u32 1, %s1367_s16  }
  0x1a   : > { %1149 = vmatprep.subr.mxu0 %v210_v3  ;;  %1182 = vmatprep.mubr.msk.f32.mxu1 %vm297_vm0, %v293_v18  ;;  %v1044_v19 = vld [vmem:[%s1697_s2 + $0x40] sm:$0xff]  ;;  %v294_v26 = vld [vmem:[%s1697_s2 + $0x8] sm:$0xff]  ;;  %v296_v30 = vld [vmem:[%s1697_s2 + $0x18] sm:$0xff]  ;;  %s1013_s9 = sshll.u32 %s188_s13, 5  ;;  %s1655_s23 = scalar_lea.sflag [#allocation3], %s188_s13 }
  0x1b   : > { %1150 = vmatpush3.msra.mxu0 %v210_v3  ;;  %v1045_v28 = vld [vmem:[%s1697_s2 + $0x48] sm:$0xff]  ;;  %v1035_v31 = vld [vmem:[%s1698_s3 + $0x78] sm:$0xff]  ;;  %v1020_v32 = vld [vmem:[%s1697_s2 + $0x20] sm:$0xff]  ;;  %s190_s10 = scalar_lea.vmem [#allocation2], %s1013_s9 }
  0x1c   : > { %1151 = vmatprep.subr.mxu0 %v209_v4  ;;  %v1047_v33 = vld [vmem:[%s1697_s2 + $0x58] sm:$0xff]  ;;  %v1021_v34 = vld [vmem:[%s1697_s2 + $0x28] sm:$0xff]  ;;  %v1022_v35 = vld [vmem:[%s1697_s2 + $0x30] sm:$0xff]  ;;  %s947_s11 = sshll.u32 %s190_s10, 4  ;;  %s1646_s11 = int_to_ptr.vmem [resolvable:$true] %s947_s11 }
  0x1d   : > { %1152 = vmatpush3.msra.mxu0 %v209_v4  ;;  %v1034_v36 = vld [vmem:[%s1698_s3 + $0x70] sm:$0xff]  ;;  %v1023_v37 = vld [vmem:[%s1697_s2 + $0x38] sm:$0xff]  ;;  %v1033_v38 = vld [vmem:[%s1698_s3 + $0x68] sm:$0xff]  ;;  %s1315_s19 = scalar_lea.vmem %s1646_s11, 512  ;;  %p1322_p0 = scmp.lt.s32.totalorder %s1646_s11, %s1320_s28 }
  0x1e   : > { %1153 = vmatprep.subr.mxu0 %v208_v6  ;;  %v1032_v39 = vld [vmem:[%s1698_s3 + $0x60] sm:$0xff]  ;;  %v1031_v40 = vld [vmem:[%s1698_s3 + $0x58] sm:$0xff]  ;;  %v1030_v41 = vld [vmem:[%s1698_s3 + $0x50] sm:$0xff]  ;;  %p1316_p11 = scmp.ne.s32.totalorder %s1646_s11, %s1315_s19  ;;  %p1323_p1 = scmp.lt.s32.totalorder %s1321_s29, %s1315_s19 }
  0x1f   : > { %1154 = vmatpush3.msra.mxu0 %v208_v6  ;;  %v1029_v42 = vld [vmem:[%s1698_s3 + $0x48] sm:$0xff]  ;;  %v1059_v43 = vld [vmem:[%s1698_s3 + $0xb8] sm:$0xff]  ;;  %v1028_v44 = vld [vmem:[%s1698_s3 + $0x40] sm:$0xff] }
  0x20   : > { %1155 = vmatprep.subr.mxu0 %v207_v7  ;;  %v1058_v45 = vld [vmem:[%s1698_s3 + $0xb0] sm:$0xff]  ;;  %v402_v46 = vld [vmem:[%s1698_s3 + $0x38] sm:$0xff]  ;;  %v1057_v47 = vld [vmem:[%s1698_s3 + $0xa8] sm:$0xff]  ;;  %p1317_p12 = pnand %p1316_p11, %p1443_p5  ;;  %p1324_p2 = por %p1323_p1, %p1322_p0 }
  0x21   : > { %1156 = vmatpush3.msra.mxu0 %v207_v7  ;;  %v1056_v48 = vld [vmem:[%s1698_s3 + $0xa0] sm:$0xff]  ;;  %v1055_v49 = vld [vmem:[%s1698_s3 + $0x98] sm:$0xff]  ;;  %v1054_v50 = vld [vmem:[%s1698_s3 + $0x90] sm:$0xff] }
  0x22   : > { %1157 = vmatprep.subr.mxu0 %v206_v8  ;;  %v1053_v51 = vld [vmem:[%s1698_s3 + $0x88] sm:$0xff]  ;;  %v1052_v52 = vld [vmem:[%s1698_s3 + $0x80] sm:$0xff]  ;;  %v401_v63 = vld [vmem:[%s1698_s3 + $0x30] sm:$0xff]  ;;  %p1318_p13 = pneg %p1317_p12 }
  0x23   : > { %1158 = vmatpush3.msra.mxu0 %v206_v8  ;;  %v400_v1 = vld [vmem:[%s1698_s3 + $0x28] sm:$0xff]  ;;  %v399_v3 = vld [vmem:[%s1698_s3 + $0x20] sm:$0xff]  ;;  %v398_v4 = vld [vmem:[%s1698_s3 + $0x18] sm:$0xff] }
  0x24   : > { %1159 = vmatprep.subr.mxu0 %v205_v9  ;;  %v397_v5 = vld [vmem:[%s1698_s3 + $0x10] sm:$0xff]  ;;  %v396_v6 = vld [vmem:[%s1698_s3 + $0x8] sm:$0xff]  ;;  %v395_v7 = vld [vmem:[%s1698_s3] sm:$0xff]  ;;  %p1325_p3 = pnand %p1324_p2, %p1318_p13 }
  0x25   : > { %1160 = vmatpush3.msra.mxu0 %v205_v9 }
  0x26   : > { %1161 = vmatprep.subr.mxu0 %v204_v10 }
  0x27   : > { %1162 = vmatpush3.msra.mxu0 %v204_v10 }
  0x28   : > { %1163 = vmatprep.subr.mxu0 %v203_v11 }
  0x29   : > { %1164 = vmatpush3.msra.mxu0 %v203_v11 }
  0x2a   : > { %1165 = vmatprep.subr.mxu0 %v202_v12 }
  0x2b   : > { %1166 = vmatpush3.msra.mxu0 %v202_v12 }
  0x2c   : > { %1167 = vmatprep.subr.mxu0 %v201_v13 }
  0x2d   : > { %1168 = vmatpush3.msra.mxu0 %v201_v13 }
  0x2e   : > { %1169 = vmatprep.subr.mxu0 %v200_v14 }
  0x2f   : > { %1170 = vmatpush3.msra.mxu0 %v200_v14 }
  0x30   : > { %1171 = vmatprep.subr.mxu0 %v199_v15 }
  0x31   : > { %1172 = vmatpush3.msra.mxu0 %v199_v15 }
  0x32   : > { %1173 = vmatprep.subr.mxu0 %v198_v16 }
  0x33   : > { %1174 = vmatpush3.msra.mxu0 %v198_v16 }
  0x34   : > { %1176 = vmatmul.mubr.f32.vlgmr.msra.gmra.mxu0 %v197_v17 }
  0x35   : > { %1246 = vmatprep.mubr.msk.f32.mxu0 %vm297_vm0, %v1044_v19 }
  0xf4   : > { %v1177_v20 = vpop.f32.mrf.mxu0 }
  0xf5   : > { %v290_v21 = vmax.f32 %v1177_v20, 0.0 }
  0xf6   : > { %v280_v22 = vpop.f32.mrf.mxu0 }
  0xf7   : > { %v292_v23 = vmin.f32 %v290_v21, 6.0  ;;  %v289_v24 = vmax.f32 %v280_v22, 0.0 }
  0xf9   : > { %v291_v25 = vmin.f32 %v289_v24, 6.0  ;;  %1178 = vmatprep.subr.mxu1 %v292_v23  ;;  %1242 = vmatprep.subr.mxu0 %v292_v23 }
  0xfa   : > { %1179 = vmatpush3.msra.mxu1 %v292_v23  ;;  %1243 = vmatpush3.msra.mxu0 %v292_v23 }
  0xfb   : > { %1180 = vmatprep.subr.mxu1 %v291_v25  ;;  %1244 = vmatprep.subr.mxu0 %v291_v25 }
  0xfc   : > { %1181 = vmatpush3.msra.mxu1 %v291_v25  ;;  %1245 = vmatpush3.msra.mxu0 %v291_v25 }
  0xfd   : > { %1183 = vmatmul.mubr.msk.f32.vlgmr.msra.gmra.mxu1 %vm297_vm0, %v294_v26  ;;  %1188 = vmatprep.subr.mxu1 %v292_v23 }
  0xfe   : > { %1189 = vmatpush3.msra.mxu1 %v292_v23  ;;  %1185 = vmatprep.mubr.msk.f32.mxu1 %vm297_vm0, %v295_v27 }
  0xff   : > { %1190 = vmatprep.subr.mxu1 %v291_v25  ;;  %1247 = vmatmul.mubr.msk.f32.vlgmr.msra.gmra.mxu0 %vm297_vm0, %v1045_v28 }
 0x100   : > { %1191 = vmatpush3.msra.mxu1 %v291_v25  ;;  %1249 = vmatprep.mubr.msk.f32.mxu0 %vm297_vm0, %v1046_v29 }
 0x101   : > { %1186 = vmatmul.mubr.msk.f32.gmra.mxu1 %vm297_vm0, %v296_v30  ;;  %1198 = vmatprep.subr.mxu1 %v1035_v31 }
 0x102   : > { %1192 = vmatprep.mubr.msk.f32.mxu1 %vm297_vm0, %v1020_v32  ;;  %1252 = vmatprep.subr.mxu0 %v1059_v43 }
 0x103   : > { %1250 = vmatmul.mubr.msk.f32.gmra.mxu0 %vm297_vm0, %v1047_v33 }
 0x104   : > { %1253 = vmatpush3.msra.mxu0 %v1059_v43 }
 0x105   : > { %1193 = vmatmul.mubr.msk.f32.vlgmr.msra.gmra.mxu1 %vm297_vm0, %v1021_v34  ;;  %1254 = vmatprep.subr.mxu0 %v1058_v45 }
 0x106   : > { %1195 = vmatprep.mubr.msk.f32.mxu1 %vm297_vm0, %v1022_v35  ;;  %1199 = vmatpush3.msra.mxu1 %v1035_v31 }
 0x107   : > { %1200 = vmatprep.subr.mxu1 %v1034_v36  ;;  %1255 = vmatpush3.msra.mxu0 %v1058_v45 }
 0x108   : > { %1201 = vmatpush3.msra.mxu1 %v1034_v36  ;;  %1256 = vmatprep.subr.mxu0 %v1057_v47 }
 0x109   : > { %1196 = vmatmul.mubr.msk.f32.gmra.mxu1 %vm297_vm0, %v1023_v37  ;;  %1202 = vmatprep.subr.mxu1 %v1033_v38 }
 0x10a   : > { %1203 = vmatpush3.msra.mxu1 %v1033_v38  ;;  %1257 = vmatpush3.msra.mxu0 %v1057_v47 }
 0x10b   : > { %1204 = vmatprep.subr.mxu1 %v1032_v39  ;;  %1258 = vmatprep.subr.mxu0 %v1056_v48 }
 0x10c   : > { %1205 = vmatpush3.msra.mxu1 %v1032_v39  ;;  %1259 = vmatpush3.msra.mxu0 %v1056_v48 }
 0x10d   : > { %1206 = vmatprep.subr.mxu1 %v1031_v40  ;;  %1260 = vmatprep.subr.mxu0 %v1055_v49 }
 0x10e   : > { %1207 = vmatpush3.msra.mxu1 %v1031_v40  ;;  %1261 = vmatpush3.msra.mxu0 %v1055_v49 }
 0x10f   : > { %1208 = vmatprep.subr.mxu1 %v1030_v41  ;;  %1262 = vmatprep.subr.mxu0 %v1054_v50 }
 0x110   : > { %1209 = vmatpush3.msra.mxu1 %v1030_v41  ;;  %1263 = vmatpush3.msra.mxu0 %v1054_v50 }
 0x111   : > { %1210 = vmatprep.subr.mxu1 %v1029_v42  ;;  %1264 = vmatprep.subr.mxu0 %v1053_v51 }
 0x112   : > { %1211 = vmatpush3.msra.mxu1 %v1029_v42  ;;  %1265 = vmatpush3.msra.mxu0 %v1053_v51 }
 0x113   : > { %1212 = vmatprep.subr.mxu1 %v1028_v44  ;;  %1266 = vmatprep.subr.mxu0 %v1052_v52 }
 0x114   : > { %1213 = vmatpush3.msra.mxu1 %v1028_v44  ;;  %1267 = vmatpush3.msra.mxu0 %v1052_v52 }
 0x115   : > { %1220 = vmatprep.subr.mxu1 %v402_v46 }
 0x1bd   : > { %v1184_v53 = vpop.f32.mrf.mxu1 }
 0x1bf   : > { %v376_v54 = vpop.f32.mrf.mxu1  ;;  %v1248_v55 = vpop.f32.mrf.mxu0 }
 0x1c1   : > { %v1187_v56 = vpop.f32.mrf.mxu1  ;;  %v792_v57 = vpop.f32.mrf.mxu0 }
 0x1c2   : > { %1268 = vmatprep.mubr.msk.f32.mxu0 %vm514_vm1, %v792_v57 }
 0x1c3   : > { %v386_v58 = vpop.f32.mrf.mxu1  ;;  %v1251_v59 = vpop.f32.mrf.mxu0  ;;  %1269 = vmatmul.mubr.msk.f32.vlgmr.msra.gmra.mxu0 %vm514_vm1, %v1248_v55 }
 0x1c5   : > { %v1194_v60 = vpop.f32.mrf.mxu1  ;;  %v802_v61 = vpop.f32.mrf.mxu0 }
 0x1c6   : > { %1271 = vmatprep.mubr.msk.f32.mxu0 %vm514_vm1, %v802_v61 }
 0x1c7   : > { %v486_v62 = vpop.f32.mrf.mxu1  ;;  %1272 = vmatmul.mubr.msk.f32.gmra.mxu0 %vm514_vm1, %v1251_v59 }
 0x1c8   : > { %1214 = vmatprep.mubr.msk.f32.mxu1 %vm514_vm1, %v486_v62 }
 0x1c9   : > { %v1197_v0 = vpop.f32.mrf.mxu1  ;;  %1215 = vmatmul.mubr.msk.f32.vlgmr.msra.gmra.mxu1 %vm514_vm1, %v1194_v60 }
 0x1ca   : > { %1221 = vmatpush3.msra.mxu1 %v402_v46 }
 0x1cb   : > { %1222 = vmatprep.subr.mxu1 %v401_v63  ;;  %v496_v2 = vpop.f32.mrf.mxu1 }
 0x1cc   : > { %1223 = vmatpush3.msra.mxu1 %v401_v63  ;;  %1217 = vmatprep.mubr.msk.f32.mxu1 %vm514_vm1, %v496_v2 }
 0x1cd   : > { %1224 = vmatprep.subr.mxu1 %v400_v1  ;;  %1218 = vmatmul.mubr.msk.f32.gmra.mxu1 %vm514_vm1, %v1197_v0 }
 0x1ce   : > { %1225 = vmatpush3.msra.mxu1 %v400_v1  ;;  %1236 = vmatprep.mubr.msk.f32.mxu1 %vm514_vm1, %v376_v54 }
 0x1cf   : > { %1226 = vmatprep.subr.mxu1 %v399_v3 }
 0x1d0   : > { %1227 = vmatpush3.msra.mxu1 %v399_v3 }
 0x1d1   : > { %1228 = vmatprep.subr.mxu1 %v398_v4 }
 0x1d2   : > { %1229 = vmatpush3.msra.mxu1 %v398_v4 }
 0x1d3   : > { %1230 = vmatprep.subr.mxu1 %v397_v5 }
 0x1d4   : > { %1231 = vmatpush3.msra.mxu1 %v397_v5 }
 0x1d5   : > { %1232 = vmatprep.subr.mxu1 %v396_v6 }
 0x1d6   : > { %1233 = vmatpush3.msra.mxu1 %v396_v6 }
 0x1d7   : > { %1234 = vmatprep.subr.mxu1 %v395_v7 }
 0x1d8   : > { %1235 = vmatpush3.msra.mxu1 %v395_v7 }
 0x1d9   : > { %1237 = vmatmul.mubr.msk.f32.vlgmr.msra.gmra.mxu1 %vm514_vm1, %v1184_v53 }
 0x1da   : > { %1239 = vmatprep.mubr.msk.f32.mxu1 %vm514_vm1, %v386_v58 }
 0x1dd   : > { %1240 = vmatmul.mubr.msk.f32.gmra.mxu1 %vm514_vm1, %v1187_v56 }
 0x283   : > { %v1270_v11 = vpop.f32.mrf.mxu0 }
 0x285   : > { %v898_v14 = vpop.f32.mrf.mxu0 }
 0x287   : > { %v1273_v19 = vpop.f32.mrf.mxu0 }
 0x289   : > { %v1216_v8 = vpop.f32.mrf.mxu1  ;;  %v908_v29 = vpop.f32.mrf.mxu0 }
 0x28b   : > { %v593_v9 = vpop.f32.mrf.mxu1 }
 0x28d   : > { %v1219_v10 = vpop.f32.mrf.mxu1 }
 0x28f   : > { %v603_v12 = vpop.f32.mrf.mxu1 }
 0x299   : > { %v1238_v13 = vpop.f32.mrf.mxu1 }
 0x29a   : > { %v696_v15 = vadd.f32 %v1238_v13, %v1216_v8 }
 0x29b   : > { %v690_v16 = vpop.f32.mrf.mxu1 }
 0x29c   : > { %v918_v17 = vadd.f32 %v1270_v11, %v696_v15  ;;  %v691_v18 = vadd.f32 %v690_v16, %v593_v9 }
 0x29d   : > { %v1241_v20 = vpop.f32.mrf.mxu1 }
 0x29e   : > { %v922_v21 = vmax.f32 %v918_v17, 0.0  ;;  %v917_v22 = vadd.f32 %v898_v14, %v691_v18  ;;  %v706_v23 = vadd.f32 %v1241_v20, %v1219_v10 }
 0x29f   : > { %v700_v24 = vpop.f32.mrf.mxu1 }
 0x2a0   : > { %v926_v25 = vmin.f32 %v922_v21, 6.0  ;;  %v921_v26 = vmax.f32 %v917_v22, 0.0  ;;  %v920_v27 = vadd.f32 %v1273_v19, %v706_v23  ;;  %v701_v28 = vadd.f32 %v700_v24, %v603_v12 }
 0x2a2   : > { %930 = vst [vmem:[%s190_s10 + $0x8] sm:$0xff] %v926_v25  ;;  %v925_v30 = vmin.f32 %v921_v26, 6.0  ;;  %v924_v31 = vmax.f32 %v920_v27, 0.0  ;;  %v919_v32 = vadd.f32 %v908_v29, %v701_v28 }
 0x2a4   : > { %929 = vst [vmem:[%s190_s10] sm:$0xff] %v925_v30  ;;  %v928_v33 = vmin.f32 %v924_v31, 6.0  ;;  %v923_v34 = vmax.f32 %v919_v32, 0.0 }
 0x2a6   : > { %932 = vst [vmem:[%s190_s10 + $0x18] sm:$0xff] %v928_v33  ;;  %v927_v35 = vmin.f32 %v923_v34, 6.0 }
 0x2a8   : > { %931 = vst [vmem:[%s190_s10 + $0x10] sm:$0xff] %v927_v35 }
 0x2a9   : > { %1328 = shalt.err (!%p1325_p3)
}
 0x2aa   : > { %s1329_s30 = scalar_lea.hbm %s1651_s22, 512  ;;  %s1333_s7 = scalar_lea.hbm %s1699_s4, 1024 }
 0x2ab   : > { %p1330_p4 = scmp.ne.s32.totalorder %s1651_s22, %s1329_s30  ;;  %p1334_p9 = scmp.lt.s32.totalorder %s1651_s22, %s1699_s4 }
 0x2ac   : > { %p1335_p10 = scmp.lt.s32.totalorder %s1333_s7, %s1329_s30 }
 0x2ad   : > { %p1331_p7 = pnand %p1330_p4, %p1443_p5 }
 0x2ae   : > { %p1336_p11 = por %p1335_p10, %p1334_p9 }
 0x2af   : > { %p1332_p8 = pneg %p1331_p7 }
 0x2b1   : > { %p1337_p12 = pnand %p1336_p11, %p1332_p8 }
 0x2b3   : > { %1340 = shalt.err (!%p1337_p12)
}
 0x2b4   : > { %s1378_s9 = smov 128   ;;  %s1379_s10 = smov 8  }
 0x2b5   : > { %1274 = dma.vmem_to_hbm [thread:$0]  (%p1443_p5), %s1646_s11, 512, %s1651_s22, %s1655_s23, %s1378_s9, %s1378_s9, %s1379_s10  }
 0x2b6 PF: > { %p1280_p13 = scmp.ge.s32.totalorder %s1375_s18, 2  ;;  %s962_s12 = sand.u32 1, %s1363_s15  }
 0x2b7   : > { %s963_s14 = scalar_lea.sflag [#allocation3], %s962_s12 }
 0x2b8   : > { %p1277_p0 = pnand %p1280_p13, %p1447_p6 }
 0x2ba   : > { %p1278_p1 = pneg %p1277_p0 }
 0x2bc   : > { %1358 = dma.done.wait (%p1278_p1), %s963_s14, 512  }
 0x2bd   : > { %1360 = vsyncadd (%p1278_p1), %s963_s14, 4294966784  ;;  %p14_p2 = scmp.ge.s32.totalorder %s1430_s21, 4   ;;  %s1702_s15 = smov %s1367_s16 }
 0x2be   : > { %s1703_s16 = smov %s1371_s17  ;;  %s1704_s17 = smov %s1441_s24 }
 0x2bf   : > { %s1705_s18 = smov %s1430_s21  ;;  %16 = sbr.rel (!%p14_p2) target bundleno = 3 (0x3), region = 75 }
 0x2c4   :  { %968 = vsyncpa [#allocation3], 1 }
 0x2c5   :  { %970 = vsyncpa [#allocation3 + $0x1], 1 }

</bundles_post_ra>
